<compile_context>
chip_gen: v5e
topology: v5e:2x2
jax: 0.10.0
libtpu: 0.0.40
codegen_flags: <defaults>
</compile_context>

<pallas_src>
import jax
import jax.numpy as jnp
from jax import lax
from jax.experimental import pallas as pl
from jax.experimental.pallas import tpu as pltpu

BN_EPS = 1e-5


def _round_up(x, mult):
    return ((x + mult - 1) // mult) * mult


def _vmem_config():
    """Generation-aware VMEM settings: (vmem_limit_bytes, live-tile budget)."""
    cap = 64 * 1024 * 1024  # assume the smallest (v7x) part if the query fails
    try:
        cap = int(getattr(pltpu.get_tpu_info(), "vmem_capacity_bytes", cap))
    except Exception:
        pass
    if cap >= 128 * 1024 * 1024:                     # v5e / v6e: 128 MiB VMEM
        return 96 * 1024 * 1024, 48 * 1024 * 1024
    return 40 * 1024 * 1024, 16 * 1024 * 1024        # v7x (64 MiB) / unknown


def _pick_tile_m(m, cin, c4, cbytes, obytes, budget_bytes, row_align):
    """Pick an M tile (multiple of row_align) fitting the live-tile budget.

    Budget covers the double-buffered streamed tiles of the heavier pass
    (pass 2: x in + out) after subtracting resident weight / affine / stats.
    """
    resident = 2 * cin * c4 * cbytes + 2 * 8 * c4 * 4 + 4 * c4 * 4
    budget = max(budget_bytes - resident, 2 * 1024 * 1024)
    per_row = 2 * cin * cbytes + 2 * c4 * obytes     # streamed x + out, double-buffered
    tm = budget // max(per_row, 1)
    tm = int(max(row_align, min(2048, (tm // row_align) * row_align)))
    tm = min(tm, _round_up(m, row_align))            # don't over-pad tiny problems
    # Guarantee >= 2 grid tiles when possible so both v7x TensorCores get work.
    tm = max(row_align, min(tm, _round_up(-(-m // 2), row_align)))
    return tm


# ----------------------------- pass 1: stats only ---------------------------
def _conv_stats_kernel(x_ref, w_ref, stats_ref):
    # x_ref:     (tm, Cin)        input pixels (f32 or bf16)
    # w_ref:     (Cin, 4*Cout_p)  folded ConvTranspose weight (resident)
    # stats_ref: (8, 4*Cout_p)    row 0 = per-column sum, row 1 = sum of squares
    y = jnp.dot(x_ref[...], w_ref[...], preferred_element_type=jnp.float32)
    stats_ref[0:1, :] = jnp.sum(y, axis=0, keepdims=True)
    stats_ref[1:2, :] = jnp.sum(y * y, axis=0, keepdims=True)
    # Rows 2..7 are never read by the wrapper: leave untouched (no zero
    # materialization, no extra vector stores).


# ----------------------------- pass 2: matmul + BN + ReLU -------------------
def _conv_bn_relu_kernel(x_ref, w_ref, scale_ref, shift_ref, o_ref):
    # x_ref:     (tm, Cin)        input pixels (f32 or bf16)
    # w_ref:     (Cin, 4*Cout_p)  folded weight (resident)
    # scale_ref: (1, 4*Cout_p)    precomputed BN scale in column layout
    # shift_ref: (1, 4*Cout_p)    precomputed BN shift
    # o_ref:     (tm, 4*Cout_p)   normalized + ReLU'd output
    y = jnp.dot(x_ref[...], w_ref[...], preferred_element_type=jnp.float32)
    out = y * scale_ref[...] + shift_ref[...]        # f32 affine (v5e VPU-safe)
    o_ref[...] = jnp.maximum(out, 0.0).astype(o_ref.dtype)


# ----------------------------- wrapper ---------------------------------------
def upconv_forward(x_nchw, weight, gamma, beta, *,
                   compute_dtype=jnp.float32, out_dtype=jnp.float32,
                   tile_m=None):
    """UpConv forward (training-mode BatchNorm statistics).

    x_nchw: (N, Cin, H, W) float32
    weight: (Cin, Cout, 2, 2) float32   (PyTorch ConvTranspose2d weight layout)
    gamma, beta: (Cout,) float32        (BatchNorm2d affine params)
    compute_dtype: MXU operand dtype (jnp.float32 or jnp.bfloat16).
    out_dtype: activation output dtype (jnp.float32 keeps module semantics).
    returns: (N, Cout, 2H, 2W) out_dtype
    """
    n, cin, h, w = x_nchw.shape
    cout = weight.shape[1]
    m = n * h * w

    # Lane-dense padding: 4*Cout_p multiple of 128 => unmasked vector stores.
    cout_p = _round_up(cout, 32)
    c4 = 4 * cout_p
    cbytes = jnp.dtype(compute_dtype).itemsize
    obytes = jnp.dtype(out_dtype).itemsize
    row_align = 32 // min(cbytes, obytes)            # 8 for f32, 16 for bf16

    vmem_limit, tile_budget = _vmem_config()

    # --- layout glue (cheap: x is Cin-wide, weight is tiny) ---
    x_flat = jnp.transpose(x_nchw, (0, 2, 3, 1)).reshape(m, cin).astype(compute_dtype)
    w_khkwco = jnp.transpose(weight, (0, 2, 3, 1))                    # (Cin, 2, 2, Cout)
    w_khkwco = jnp.pad(w_khkwco, ((0, 0), (0, 0), (0, 0), (0, cout_p - cout)))
    w_flat = w_khkwco.reshape(cin, c4).astype(compute_dtype)          # cols = (kh, kw, co)
    gamma_p = jnp.pad(gamma.astype(jnp.float32), (0, cout_p - cout))  # pad channels: gamma=0
    beta_p = jnp.pad(beta.astype(jnp.float32), (0, cout_p - cout))    # pad channels: beta=0

    # --- M tiling (zero-pad rows; zeros don't perturb sums, true count used) ---
    tm = int(tile_m) if tile_m else _pick_tile_m(m, cin, c4, cbytes, obytes,
                                                 tile_budget, row_align)
    tm = max(row_align, (tm // row_align) * row_align)
    mp = _round_up(m, tm)
    if mp != m:
        x_flat = jnp.pad(x_flat, ((0, mp - m), (0, 0)))
    n_tiles = mp // tm

    # --- pass 1: per-tile column sum / sum-of-squares partials (no y stash) ---
    stats = pl.pallas_call(
        _conv_stats_kernel,
        out_shape=jax.ShapeDtypeStruct((n_tiles * 8, c4), jnp.float32),
        grid=(n_tiles,),
        in_specs=[
            pl.BlockSpec((tm, cin), lambda i: (i, 0)),
            pl.BlockSpec((cin, c4), lambda i: (0, 0)),   # weight resident
        ],
        out_specs=pl.BlockSpec((8, c4), lambda i: (i, 0)),
        compiler_params=pltpu.CompilerParams(
            dimension_semantics=("parallel",),
            vmem_limit_bytes=vmem_limit,
        ),
        cost_estimate=pl.CostEstimate(
            flops=2 * mp * cin * c4 + 3 * mp * c4,
            transcendentals=0,
            bytes_accessed=(mp * cin + cin * c4) * cbytes + n_tiles * 8 * c4 * 4,
        ),
    )(x_flat, w_flat)

    # --- tiny per-channel BN math (f32), done once in the wrapper ---
    stats = stats.reshape(n_tiles, 8, c4)
    col_sum = jnp.sum(stats[:, 0, :], axis=0)                  # (4*Cout_p,)
    col_ssq = jnp.sum(stats[:, 1, :], axis=0)
    ch_sum = col_sum.reshape(4, cout_p).sum(axis=0)            # fold the 4 taps
    ch_ssq = col_ssq.reshape(4, cout_p).sum(axis=0)
    count = 4.0 * m                                            # true elements per channel
    mean = ch_sum / count
    # TODO(synk): E[y^2]-E[y]^2 can cancel for large activation offsets; a
    # shifted / two-pass (y-mean)^2 reduction would be safer in that regime.
    var = jnp.maximum(ch_ssq / count - mean * mean, 0.0)
    scale = gamma_p * lax.rsqrt(var + BN_EPS)                  # (Cout_p,)
    shift = beta_p - mean * scale
    scale4 = jnp.tile(scale, 4).reshape(1, c4)                 # broadcast to (kh,kw,co) cols
    shift4 = jnp.tile(shift, 4).reshape(1, c4)

    # --- pass 2: recompute matmul, fused affine + ReLU (lane-dense stores) ---
    out_flat = pl.pallas_call(
        _conv_bn_relu_kernel,
        out_shape=jax.ShapeDtypeStruct((mp, c4), out_dtype),
        grid=(n_tiles,),
        in_specs=[
            pl.BlockSpec((tm, cin), lambda i: (i, 0)),
            pl.BlockSpec((cin, c4), lambda i: (0, 0)),   # weight resident
            pl.BlockSpec((1, c4), lambda i: (0, 0)),
            pl.BlockSpec((1, c4), lambda i: (0, 0)),
        ],
        out_specs=pl.BlockSpec((tm, c4), lambda i: (i, 0)),
        compiler_params=pltpu.CompilerParams(
            dimension_semantics=("parallel",),
            vmem_limit_bytes=vmem_limit,
        ),
        cost_estimate=pl.CostEstimate(
            flops=2 * mp * cin * c4 + 3 * mp * c4,
            transcendentals=0,
            bytes_accessed=(mp * cin + cin * c4) * cbytes + 2 * c4 * 4
            + mp * c4 * obytes,
        ),
    )(x_flat, w_flat, scale4, shift4)

    # --- glue back to NCHW (single XLA permute; NCHW is forced by the module) ---
    y6 = out_flat[:m].reshape(n, h, w, 2, 2, cout_p)[..., :cout]
    out = jnp.transpose(y6, (0, 5, 1, 3, 2, 4)).reshape(n, cout, 2 * h, 2 * w)
    return out


# TODO(synk): BatchNorm2d running_mean/running_var updates and eval-mode
# normalization are not implemented (they don't affect this training-mode
# forward output).
def _reference_upconv(x_nchw, weight, gamma, beta):
    """Pure-JAX f32 reference (no Pallas) for correctness checking."""
    n, cin, h, w = x_nchw.shape
    cout = weight.shape[1]
    y = jnp.einsum('nchw,cokl->nohkwl', x_nchw, weight).reshape(n, cout, 2 * h, 2 * w)
    mean = jnp.mean(y, axis=(0, 2, 3), keepdims=True)
    var = jnp.mean(y * y, axis=(0, 2, 3), keepdims=True) - mean * mean
    y_hat = (y - mean) * lax.rsqrt(var + BN_EPS)
    y_bn = y_hat * gamma.reshape(1, cout, 1, 1) + beta.reshape(1, cout, 1, 1)
    return jnp.maximum(y_bn, 0.0)


if __name__ == "__main__":
    # Small deterministic example consistent with the module: NCHW input.
    N, CH_IN, CH_OUT, H, W = 2, 4, 8, 16, 16

    key = jax.random.PRNGKey(0)
    kx, kw = jax.random.split(key)
    x = jax.random.normal(kx, (N, CH_IN, H, W), dtype=jnp.float32)
    weight = 0.1 * jax.random.normal(kw, (CH_IN, CH_OUT, 2, 2), dtype=jnp.float32)
    gamma = jnp.ones((CH_OUT,), dtype=jnp.float32)   # BatchNorm2d default init
    beta = jnp.zeros((CH_OUT,), dtype=jnp.float32)

    fwd = jax.jit(upconv_forward,
                  static_argnames=("compute_dtype", "out_dtype", "tile_m"))
    ref = _reference_upconv(x, weight, gamma, beta)

    # f32 path: tight tolerance.
    out = jax.block_until_ready(fwd(x, weight, gamma, beta))
    assert out.shape == (N, CH_OUT, 2 * H, 2 * W), out.shape
    assert jnp.allclose(out, ref, rtol=1e-4, atol=1e-4), float(jnp.max(jnp.abs(out - ref)))

    # bf16 MXU operands (v6e/v7x bandwidth/compute optimization): looser tolerance.
    out_bf16 = jax.block_until_ready(fwd(x, weight, gamma, beta, compute_dtype=jnp.bfloat16))
    assert out_bf16.shape == (N, CH_OUT, 2 * H, 2 * W), out_bf16.shape
    assert jnp.allclose(out_bf16, ref, rtol=5e-2, atol=5e-2), float(jnp.max(jnp.abs(out_bf16 - ref)))

    print("KERNEL_OK")
</pallas_src>

<mosaic_0001>
module attributes {stable_mosaic.version = 11 : i64} {
  func.func @_conv_stats_kernel(%arg0: i32, %arg1: memref<256x4xf32, #tpu.memory_space<vmem>>, %arg2: memref<4x128xf32, #tpu.memory_space<vmem>>, %arg3: memref<8x128xf32, #tpu.memory_space<vmem>>) attributes {dimension_semantics = [#tpu.dimension_semantics<parallel>], iteration_bounds = array<i64: 2>, scalar_prefetch = 0 : i64, scratch_operands = 0 : i64, tpu.core_type = #tpu.core_type<tc>, window_params = [{transform_indices = @transform_0, window_bounds = array<i64: 256, 4>}, {pipeline_mode = #tpu.pipeline_mode<synchronous>, transform_indices = @transform_1, window_bounds = array<i64: 4, 128>}, {transform_indices = @transform_2, window_bounds = array<i64: 8, 128>}]} {
    %c0 = arith.constant 0 : index
    %c0_0 = arith.constant 0 : index
    %0 = vector.load %arg1[%c0, %c0_0] : memref<256x4xf32, #tpu.memory_space<vmem>>, vector<256x4xf32>
    %c0_1 = arith.constant 0 : index
    %c0_2 = arith.constant 0 : index
    %1 = vector.load %arg2[%c0_1, %c0_2] : memref<4x128xf32, #tpu.memory_space<vmem>>, vector<4x128xf32>
    %cst = arith.constant dense<0.000000e+00> : vector<256x128xf32>
    %2 = tpu.matmul %0, %1, %cst {dimension_numbers = #tpu.dot_dimension_numbers<[1], [0], [0], [1], [0, 0, 1, 1], [], []>} : vector<256x4xf32>, vector<4x128xf32>, vector<256x128xf32> -> vector<256x128xf32>
    %cst_3 = arith.constant dense<0.000000e+00> : vector<128xf32>
    %3 = vector.multi_reduction <add>, %2, %cst_3 [0] : vector<256x128xf32> to vector<128xf32>
    %4 = vector.shape_cast %3 : vector<128xf32> to vector<1x128xf32>
    %c0_4 = arith.constant 0 : index
    %c0_5 = arith.constant 0 : index
    %5 = vector.load %arg3[%c0_4, %c0_5] : memref<8x128xf32, #tpu.memory_space<vmem>>, vector<1x128xf32>
    tpu.vector_store %arg3[%c0_4, %c0_5], %4 {strides = array<i32>} : memref<8x128xf32, #tpu.memory_space<vmem>>, vector<1x128xf32>,
    %6 = arith.mulf %2, %2 : vector<256x128xf32>
    %cst_6 = arith.constant dense<0.000000e+00> : vector<128xf32>
    %7 = vector.multi_reduction <add>, %6, %cst_6 [0] : vector<256x128xf32> to vector<128xf32>
    %8 = vector.shape_cast %7 : vector<128xf32> to vector<1x128xf32>
    %c1 = arith.constant 1 : index
    %c0_7 = arith.constant 0 : index
    %9 = vector.load %arg3[%c1, %c0_7] : memref<8x128xf32, #tpu.memory_space<vmem>>, vector<1x128xf32>
    tpu.vector_store %arg3[%c1, %c0_7], %8 {strides = array<i32>} : memref<8x128xf32, #tpu.memory_space<vmem>>, vector<1x128xf32>,
    return
  }
  func.func @transform_0(%arg0: i32) -> (i32, i32) {
    %c0_i32 = arith.constant 0 : i32
    %c0_i32_0 = arith.constant 0 : i32
    return %arg0, %c0_i32 : i32, i32
  }
  func.func @transform_1(%arg0: i32) -> (i32, i32) {
    %c0_i32 = arith.constant 0 : i32
    %c0_i32_0 = arith.constant 0 : i32
    %c0_i32_1 = arith.constant 0 : i32
    return %c0_i32, %c0_i32_0 : i32, i32
  }
  func.func @transform_2(%arg0: i32) -> (i32, i32) {
    %c0_i32 = arith.constant 0 : i32
    %c0_i32_0 = arith.constant 0 : i32
    return %arg0, %c0_i32 : i32, i32
  }
}

module attributes {stable_mosaic.version = 11 : i64} {
  func.func @_conv_bn_relu_kernel(%arg0: i32, %arg1: memref<256x4xf32, #tpu.memory_space<vmem>>, %arg2: memref<4x128xf32, #tpu.memory_space<vmem>>, %arg3: memref<1x128xf32, #tpu.memory_space<vmem>>, %arg4: memref<1x128xf32, #tpu.memory_space<vmem>>, %arg5: memref<256x128xf32, #tpu.memory_space<vmem>>) attributes {dimension_semantics = [#tpu.dimension_semantics<parallel>], iteration_bounds = array<i64: 2>, scalar_prefetch = 0 : i64, scratch_operands = 0 : i64, tpu.core_type = #tpu.core_type<tc>, window_params = [{transform_indices = @transform_0, window_bounds = array<i64: 256, 4>}, {pipeline_mode = #tpu.pipeline_mode<synchronous>, transform_indices = @transform_1, window_bounds = array<i64: 4, 128>}, {pipeline_mode = #tpu.pipeline_mode<synchronous>, transform_indices = @transform_2, window_bounds = array<i64: 1, 128>}, {pipeline_mode = #tpu.pipeline_mode<synchronous>, transform_indices = @transform_3, window_bounds = array<i64: 1, 128>}, {transform_indices = @transform_4, window_bounds = array<i64: 256, 128>}]} {
    %c0 = arith.constant 0 : index
    %c0_0 = arith.constant 0 : index
    %0 = vector.load %arg1[%c0, %c0_0] : memref<256x4xf32, #tpu.memory_space<vmem>>, vector<256x4xf32>
    %c0_1 = arith.constant 0 : index
    %c0_2 = arith.constant 0 : index
    %1 = vector.load %arg2[%c0_1, %c0_2] : memref<4x128xf32, #tpu.memory_space<vmem>>, vector<4x128xf32>
    %cst = arith.constant dense<0.000000e+00> : vector<256x128xf32>
    %2 = tpu.matmul %0, %1, %cst {dimension_numbers = #tpu.dot_dimension_numbers<[1], [0], [0], [1], [0, 0, 1, 1], [], []>} : vector<256x4xf32>, vector<4x128xf32>, vector<256x128xf32> -> vector<256x128xf32>
    %c0_3 = arith.constant 0 : index
    %c0_4 = arith.constant 0 : index
    %3 = vector.load %arg3[%c0_3, %c0_4] : memref<1x128xf32, #tpu.memory_space<vmem>>, vector<1x128xf32>
    %4 = vector.broadcast %3 : vector<1x128xf32> to vector<256x128xf32>
    %5 = arith.mulf %2, %4 : vector<256x128xf32>
    %c0_5 = arith.constant 0 : index
    %c0_6 = arith.constant 0 : index
    %6 = vector.load %arg4[%c0_5, %c0_6] : memref<1x128xf32, #tpu.memory_space<vmem>>, vector<1x128xf32>
    %7 = vector.broadcast %6 : vector<1x128xf32> to vector<256x128xf32>
    %8 = arith.addf %5, %7 : vector<256x128xf32>
    %cst_7 = arith.constant 0.000000e+00 : f32
    %9 = vector.broadcast %cst_7 : f32 to vector<256x128xf32>
    %10 = arith.maximumf %8, %9 : vector<256x128xf32>
    %c0_8 = arith.constant 0 : index
    %c0_9 = arith.constant 0 : index
    %11 = vector.load %arg5[%c0_8, %c0_9] : memref<256x128xf32, #tpu.memory_space<vmem>>, vector<256x128xf32>
    tpu.vector_store %arg5[%c0_8, %c0_9], %10 {strides = array<i32>} : memref<256x128xf32, #tpu.memory_space<vmem>>, vector<256x128xf32>,
    return
  }
  func.func @transform_0(%arg0: i32) -> (i32, i32) {
    %c0_i32 = arith.constant 0 : i32
    %c0_i32_0 = arith.constant 0 : i32
    return %arg0, %c0_i32 : i32, i32
  }
  func.func @transform_1(%arg0: i32) -> (i32, i32) {
    %c0_i32 = arith.constant 0 : i32
    %c0_i32_0 = arith.constant 0 : i32
    %c0_i32_1 = arith.constant 0 : i32
    return %c0_i32, %c0_i32_0 : i32, i32
  }
  func.func @transform_2(%arg0: i32) -> (i32, i32) {
    %c0_i32 = arith.constant 0 : i32
    %c0_i32_0 = arith.constant 0 : i32
    %c0_i32_1 = arith.constant 0 : i32
    return %c0_i32, %c0_i32_0 : i32, i32
  }
  func.func @transform_3(%arg0: i32) -> (i32, i32) {
    %c0_i32 = arith.constant 0 : i32
    %c0_i32_0 = arith.constant 0 : i32
    %c0_i32_1 = arith.constant 0 : i32
    return %c0_i32, %c0_i32_0 : i32, i32
  }
  func.func @transform_4(%arg0: i32) -> (i32, i32) {
    %c0_i32 = arith.constant 0 : i32
    %c0_i32_0 = arith.constant 0 : i32
    return %arg0, %c0_i32 : i32, i32
  }
}

</mosaic_0001>

<bundles_post_ra>
// kernel: tile.18
= control target key start
LH: loop header
LB: loop body
LE: loop exit
PB: predicated region body
PF: predicated region fallthrough
CT: control target
= control target key end

     0   :  { %s22_s0 = inlined_call_operand.vmem [shape: f32[32], index: 0, kind: input, shape index: {}]   ;;  %s23_s1 = inlined_call_operand.vmem [shape: f32[4,32], index: 1, kind: output, shape index: {}]  }
   0x1   :  { %v4_v0 = vld [vmem:[%s22_s0] ss:$0 sm:$0xff] }
   0x2   :  { %5 = vst [vmem:[%s23_s1] sm:$0xf] %v4_v0 }

// kernel: tile.19
= control target key start
LH: loop header
LB: loop body
LE: loop exit
PB: predicated region body
PF: predicated region fallthrough
CT: control target
= control target key end

     0   :  { %s37_s8 = smov 32   ;;  %s38_s9 = smov 64   ;;  %vm7_vm0 = vcmask 261120   ;;  %vm13_vm1 = vcmask 1048320   ;;  %vm19_vm2 = vcmask 785920   ;;  %vm25_vm3 = vcmask 523520   ;;  %s55_s0 = inlined_call_operand.vmem [shape: f32[4,32], index: 0, kind: input, shape index: {}]   ;;  %s56_s1 = inlined_call_operand.vmem [shape: f32[1,128], index: 1, kind: output, shape index: {}]  }
   0x1   :  { %v4_v0 = vld [vmem:[%s55_s0] sm:$0xf]  ;;  %s36_s0 = smov 96  }
   0x2   :  { %5 = vst [vmem:[#allocation1] sm:$0xf] %v4_v0 }
   0x9   :  { %v10_v1 = vld [vmem:[#allocation1 + $0x3] sm:$0x1]   ;;  %v22_v2 = vld [vmem:[#allocation1 + $0x1] sm:$0x1]   ;;  %v16_v3 = vld [vmem:[#allocation1 + $0x2] sm:$0x1]  }
   0xa   :  { %11 = vrot.lane.b32.xlu0 %v10_v1, %s36_s0  ;;  %23 = vrot.lane.b32.xlu1 %v22_v2, %s37_s8  ;;  %v6_v4 = vld [vmem:[#allocation1] sm:$0x1]  }
   0xb   :  { %8 = vst.msk [vmem:[#allocation0] sm:$0x1] %vm7_vm0, %v6_v4  }
  0x12   :  { %17 = vrot.lane.b32.xlu0 %v16_v3, %s38_s9 }
  0x7c   :  { %v12_v5 = vpop.permute.xlu0 %11   ;;  %v24_v6 = vpop.permute.xlu1 %23  }
  0x7d   :  { %14 = vst.msk [vmem:[#allocation0] sm:$0x1] %vm13_vm1, %v12_v5  }
  0x84   :  { %v18_v7 = vpop.permute.xlu0 %17  }
  0x85   :  { %20 = vst.msk [vmem:[#allocation0] sm:$0x1] %vm19_vm2, %v18_v7  }
  0x86   :  { %26 = vst.msk [vmem:[#allocation0] sm:$0x1] %vm25_vm3, %v24_v6  }
  0x8d   :  { %v29_v8 = vld [vmem:[#allocation0] sm:$0x1] }
  0x8e   :  { %32 = vst [vmem:[%s56_s1] sm:$0x1] %v29_v8 }

// kernel: upconv_forward.2
= control target key start
LH: loop header
LB: loop body
LE: loop exit
PB: predicated region body
PF: predicated region fallthrough
CT: control target
= control target key end

     0   :  { %s629_s9 = smov 0   ;;  %s760_s0 = inlined_call_operand.vmem [shape: f32[512,4], index: 0, kind: input, shape index: {}]   ;;  %s761_s1 = inlined_call_operand.vmem [shape: f32[4,128], index: 1, kind: input, shape index: {}]   ;;  %s762_s2 = inlined_call_operand.vmem [shape: f32[16,128], index: 2, kind: output, shape index: {}]  }
   0x1 LB: > { %s635_s10 = sadd.s32 4294967295, %s612_s9   ;;  %p556_p0 = scmp.ge.s32.totalorder %s612_s9, 1  ;;  %s612_s9 = sphi %s629_s9, %s12_s9  }
   0x2   : > { %p113_p1 = scmp.lt.s32.totalorder %s612_s9, 3 }
   0x4   : > { %p114_p2 = pnand %p556_p0, %p113_p1 }
   0x5   : > { %s557_s13 = sshll.u32 (!%p114_p2), %s635_s10, 5  ;;  %p140_p4 = scmp.lt.s32.totalorder (!%p114_p2), %s635_s10, 1 }
   0x6   : > { %117 = sbr.rel (%p114_p2) target bundleno = 262 (0x106), region = 28  ;;  %p135_p3 = scmp.lt.s32.totalorder (!%p114_p2), %s557_s13, 63 }
   0xb   : > { %v176_v0 = vld [vmem:[%s761_s1] sm:$0xf]  ;;  %vm274_vm0 = vcmask 1043456   ;;  %s764_s13 = smov (!%p135_p3, %s557_s13), 63  ;;  %vm177_vm1 = vcmask 31744   ;;  %s766_s10 = smov (!%p140_p4, %s635_s10), 1 }
   0xc   : > { %560 = vmatpush.msk.msra.mxu0 %vm274_vm0, %v176_v0  ;;  %595 = vmatpush.msk.msra.mxu1 %vm274_vm0, %v176_v0  ;;  %s558_s14 = sshll.u32 %s764_s13, 3  ;;  %s559_s18 = sshll.u32 %s766_s10, 3 }
   0xd   : > { %596 = vmatpush.msk.msra.mxu2 %vm274_vm0, %v176_v0  ;;  %597 = vmatpush.msk.msra.mxu3 %vm274_vm0, %v176_v0  ;;  %s646_s17 = scalar_lea.vmem %s760_s0, %s558_s14  ;;  %s143_s21 = scalar_lea.vmem %s762_s2, %s559_s18 }
   0xe   : > { %v144_v1 = vld [vmem:[%s646_s17] sm:$0xff]  ;;  %v145_v4 = vld [vmem:[%s646_s17 + $0x8] sm:$0xff]  ;;  %v146_v8 = vld [vmem:[%s646_s17 + $0x10] sm:$0xff] }
   0xf   : > { %561 = vmatmul.msk.f32.vlgmr.msra.gmra.mxu0 %vm177_vm1, %v144_v1  ;;  %v152_v2 = vld [vmem:[%s646_s17 + $0x40] sm:$0xff]  ;;  %v153_v5 = vld [vmem:[%s646_s17 + $0x48] sm:$0xff]  ;;  %v154_v9 = vld [vmem:[%s646_s17 + $0x50] sm:$0xff] }
  0x10   : > { %569 = vmatmul.msk.f32.vlgmr.msra.gmra.mxu1 %vm177_vm1, %v152_v2  ;;  %v160_v3 = vld [vmem:[%s646_s17 + $0x80] sm:$0xff]  ;;  %v161_v6 = vld [vmem:[%s646_s17 + $0x88] sm:$0xff]  ;;  %v162_v10 = vld [vmem:[%s646_s17 + $0x90] sm:$0xff] }
  0x11   : > { %577 = vmatmul.msk.f32.vlgmr.msra.gmra.mxu2 %vm177_vm1, %v160_v3  ;;  %v168_v7 = vld [vmem:[%s646_s17 + $0xc0] sm:$0xff]  ;;  %v169_v11 = vld [vmem:[%s646_s17 + $0xc8] sm:$0xff]  ;;  %v147_v12 = vld [vmem:[%s646_s17 + $0x18] sm:$0xff] }
  0x12   : > { %585 = vmatmul.msk.f32.vlgmr.msra.gmra.mxu3 %vm177_vm1, %v168_v7  ;;  %v155_v13 = vld [vmem:[%s646_s17 + $0x58] sm:$0xff]  ;;  %v170_v15 = vld [vmem:[%s646_s17 + $0xd0] sm:$0xff]  ;;  %v148_v16 = vld [vmem:[%s646_s17 + $0x20] sm:$0xff] }
  0x13   : > { %v163_v14 = vld [vmem:[%s646_s17 + $0x98] sm:$0xff]  ;;  %v156_v17 = vld [vmem:[%s646_s17 + $0x60] sm:$0xff]  ;;  %v149_v20 = vld [vmem:[%s646_s17 + $0x28] sm:$0xff] }
  0x14   : > { %v171_v18 = vld [vmem:[%s646_s17 + $0xd8] sm:$0xff]  ;;  %v164_v19 = vld [vmem:[%s646_s17 + $0xa0] sm:$0xff]  ;;  %v157_v21 = vld [vmem:[%s646_s17 + $0x68] sm:$0xff] }
  0x15   : > { %v172_v22 = vld [vmem:[%s646_s17 + $0xe0] sm:$0xff]  ;;  %v165_v23 = vld [vmem:[%s646_s17 + $0xa8] sm:$0xff]  ;;  %v150_v24 = vld [vmem:[%s646_s17 + $0x30] sm:$0xff] }
  0x16   : > { %v158_v25 = vld [vmem:[%s646_s17 + $0x70] sm:$0xff]  ;;  %v173_v26 = vld [vmem:[%s646_s17 + $0xe8] sm:$0xff]  ;;  %v151_v28 = vld [vmem:[%s646_s17 + $0x38] sm:$0xff] }
  0x17   : > { %562 = vmatmul.msk.f32.gmra.mxu0 %vm177_vm1, %v145_v4  ;;  %v166_v27 = vld [vmem:[%s646_s17 + $0xb0] sm:$0xff]  ;;  %v159_v29 = vld [vmem:[%s646_s17 + $0x78] sm:$0xff] }
  0x18   : > { %570 = vmatmul.msk.f32.gmra.mxu1 %vm177_vm1, %v153_v5  ;;  %v174_v30 = vld [vmem:[%s646_s17 + $0xf0] sm:$0xff]  ;;  %v167_v31 = vld [vmem:[%s646_s17 + $0xb8] sm:$0xff] }
  0x19   : > { %578 = vmatmul.msk.f32.gmra.mxu2 %vm177_vm1, %v161_v6  ;;  %v175_v32 = vld [vmem:[%s646_s17 + $0xf8] sm:$0xff] }
  0x1a   : > { %586 = vmatmul.msk.f32.gmra.mxu3 %vm177_vm1, %v169_v11 }
  0x1f   : > { %563 = vmatmul.msk.f32.gmra.mxu0 %vm177_vm1, %v146_v8 }
  0x20   : > { %571 = vmatmul.msk.f32.gmra.mxu1 %vm177_vm1, %v154_v9 }
  0x21   : > { %579 = vmatmul.msk.f32.gmra.mxu2 %vm177_vm1, %v162_v10 }
  0x22   : > { %587 = vmatmul.msk.f32.gmra.mxu3 %vm177_vm1, %v170_v15 }
  0x27   : > { %564 = vmatmul.msk.f32.gmra.mxu0 %vm177_vm1, %v147_v12 }
  0x28   : > { %572 = vmatmul.msk.f32.gmra.mxu1 %vm177_vm1, %v155_v13 }
  0x29   : > { %580 = vmatmul.msk.f32.gmra.mxu2 %vm177_vm1, %v163_v14 }
  0x2a   : > { %588 = vmatmul.msk.f32.gmra.mxu3 %vm177_vm1, %v171_v18 }
  0x2f   : > { %565 = vmatmul.msk.f32.gmra.mxu0 %vm177_vm1, %v148_v16 }
  0x30   : > { %573 = vmatmul.msk.f32.gmra.mxu1 %vm177_vm1, %v156_v17 }
  0x31   : > { %581 = vmatmul.msk.f32.gmra.mxu2 %vm177_vm1, %v164_v19 }
  0x32   : > { %589 = vmatmul.msk.f32.gmra.mxu3 %vm177_vm1, %v172_v22 }
  0x37   : > { %566 = vmatmul.msk.f32.gmra.mxu0 %vm177_vm1, %v149_v20 }
  0x38   : > { %574 = vmatmul.msk.f32.gmra.mxu1 %vm177_vm1, %v157_v21 }
  0x39   : > { %582 = vmatmul.msk.f32.gmra.mxu2 %vm177_vm1, %v165_v23 }
  0x3a   : > { %590 = vmatmul.msk.f32.gmra.mxu3 %vm177_vm1, %v173_v26 }
  0x3f   : > { %567 = vmatmul.msk.f32.gmra.mxu0 %vm177_vm1, %v150_v24 }
  0x40   : > { %575 = vmatmul.msk.f32.gmra.mxu1 %vm177_vm1, %v158_v25 }
  0x41   : > { %583 = vmatmul.msk.f32.gmra.mxu2 %vm177_vm1, %v166_v27 }
  0x42   : > { %591 = vmatmul.msk.f32.gmra.mxu3 %vm177_vm1, %v174_v30 }
  0x47   : > { %568 = vmatmul.msk.f32.gmra.mxu0 %vm177_vm1, %v151_v28 }
  0x48   : > { %576 = vmatmul.msk.f32.gmra.mxu1 %vm177_vm1, %v159_v29 }
  0x49   : > { %584 = vmatmul.msk.f32.gmra.mxu2 %vm177_vm1, %v167_v31 }
  0x4a   : > { %592 = vmatmul.msk.f32.gmra.mxu3 %vm177_vm1, %v175_v32 }
  0x8c   : > { %v295_v33 = vpop.f32.mrf.mxu0 }
  0x8d   : > { %v319_v34 = vpop.f32.mrf.mxu1  ;;  %v429_v51 = vmul.f32 %v295_v33, %v295_v33 }
  0x8e   : > { %v437_v13 = vmul.f32 %v319_v34, %v319_v34 }
  0x94   : > { %v298_v35 = vpop.f32.mrf.mxu0  ;;  %v712_v37 = vpop.f32.mrf.mxu2 }
  0x95   : > { %v322_v36 = vpop.f32.mrf.mxu1  ;;  %v716_v43 = vpop.f32.mrf.mxu3  ;;  %v430_v49 = vmul.f32 %v298_v35, %v298_v35  ;;  %v391_v52 = vadd.f32 %v298_v35, %v295_v33 }
  0x96   : > { %v438_v17 = vmul.f32 %v322_v36, %v322_v36 }
  0x97   : > { %v461_v54 = vadd.f32 %v430_v49, %v429_v51  ;;  %v445_v49 = vmul.f32 %v712_v37, %v712_v37 }
  0x9c   : > { %v301_v38 = vpop.f32.mrf.mxu0  ;;  %v714_v41 = vpop.f32.mrf.mxu2 }
  0x9d   : > { %v325_v39 = vpop.f32.mrf.mxu1  ;;  %v720_v48 = vpop.f32.mrf.mxu3  ;;  %v431_v53 = vmul.f32 %v301_v38, %v301_v38  ;;  %v392_v55 = vadd.f32 %v391_v52, %v301_v38 }
  0x9e   : > { %v439_v20 = vmul.f32 %v325_v39, %v325_v39 }
  0x9f   : > { %v462_v59 = vadd.f32 %v461_v54, %v431_v53 }
  0xa4   : > { %v304_v40 = vpop.f32.mrf.mxu0  ;;  %v718_v45 = vpop.f32.mrf.mxu2 }
  0xa5   : > { %v328_v42 = vpop.f32.mrf.mxu1  ;;  %v432_v56 = vmul.f32 %v304_v40, %v304_v40  ;;  %v393_v60 = vadd.f32 %v392_v55, %v304_v40  ;;  %v724_v62 = vpop.f32.mrf.mxu3  ;;  %v447_v54 = vmul.f32 %v718_v45, %v718_v45 }
  0xa6   : > { %v440_v24 = vmul.f32 %v328_v42, %v328_v42 }
  0xa7   : > { %v463_v63 = vadd.f32 %v462_v59, %v432_v56 }
  0xac   : > { %v307_v44 = vpop.f32.mrf.mxu0  ;;  %v722_v50 = vpop.f32.mrf.mxu2 }
  0xad   : > { %v331_v46 = vpop.f32.mrf.mxu1  ;;  %v433_v61 = vmul.f32 %v307_v44, %v307_v44  ;;  %v394_v0 = vadd.f32 %v393_v60, %v307_v44  ;;  %v726_v16 = vpop.f32.mrf.mxu3 }
  0xae   : > { %v441_v27 = vmul.f32 %v331_v46, %v331_v46 }
  0xaf   : > { %v464_v2 = vadd.f32 %v463_v63, %v433_v61 }
  0xb4   : > { %v310_v47 = vpop.f32.mrf.mxu0  ;;  %v355_v5 = vpop.f32.mrf.mxu2 }
  0xb5   : > { %v334_v58 = vpop.f32.mrf.mxu1  ;;  %v434_v1 = vmul.f32 %v310_v47, %v310_v47  ;;  %v395_v3 = vadd.f32 %v394_v0, %v310_v47  ;;  %v449_v60 = vmul.f32 %v355_v5, %v355_v5 }
  0xb6   : > { %v442_v32 = vmul.f32 %v334_v58, %v334_v58 }
  0xb7   : > { %v465_v6 = vadd.f32 %v464_v2, %v434_v1 }
  0xbc   : > { %v313_v57 = vpop.f32.mrf.mxu0  ;;  %v358_v23 = vpop.f32.mrf.mxu2 }
  0xbd   : > { %v435_v4 = vmul.f32 %v313_v57, %v313_v57  ;;  %v396_v7 = vadd.f32 %v395_v3, %v313_v57  ;;  %v337_v12 = vpop.f32.mrf.mxu1 }
  0xbe   : > { %v443_v40 = vmul.f32 %v337_v12, %v337_v12 }
  0xbf   : > { %v466_v9 = vadd.f32 %v465_v6, %v435_v4 }
  0xc4   : > { %v316_v8 = vpop.f32.mrf.mxu0 }
  0xc5   : > { %v397_v10 = vadd.f32 %v396_v7, %v316_v8  ;;  %v436_v11 = vmul.f32 %v316_v8, %v316_v8  ;;  %v340_v30 = vpop.f32.mrf.mxu1 }
  0xc7   : > { %v398_v14 = vadd.f32 %v397_v10, %v319_v34  ;;  %v467_v15 = vadd.f32 %v466_v9, %v436_v11  ;;  %v379_v34 = vpop.f32.mrf.mxu3  ;;  %v453_v10 = vmul.f32 %v716_v43, %v716_v43 }
  0xc9   : > { %v399_v18 = vadd.f32 %v398_v14, %v322_v36  ;;  %v468_v19 = vadd.f32 %v467_v15, %v437_v13  ;;  %v444_v36 = vmul.f32 %v340_v30, %v340_v30  ;;  %v455_v14 = vmul.f32 %v724_v62, %v724_v62 }
  0xcb   : > { %v400_v21 = vadd.f32 %v399_v18, %v325_v39  ;;  %v469_v22 = vadd.f32 %v468_v19, %v438_v17  ;;  %v361_v39 = vpop.f32.mrf.mxu2  ;;  %v456_v18 = vmul.f32 %v726_v16, %v726_v16 }
  0xcc   : > { %v451_v6 = vmul.f32 %v361_v39, %v361_v39 }
  0xcd   : > { %v470_v25 = vadd.f32 %v469_v22, %v439_v20  ;;  %v401_v26 = vadd.f32 %v400_v21, %v328_v42  ;;  %v457_v20 = vmul.f32 %v379_v34, %v379_v34 }
  0xcf   : > { %v402_v28 = vadd.f32 %v401_v26, %v331_v46  ;;  %v471_v29 = vadd.f32 %v470_v25, %v440_v24  ;;  %v446_v46 = vmul.f32 %v714_v41, %v714_v41  ;;  %v382_v57 = vpop.f32.mrf.mxu3 }
  0xd0   : > { %v458_v24 = vmul.f32 %v382_v57, %v382_v57 }
  0xd1   : > { %v403_v31 = vadd.f32 %v402_v28, %v334_v58  ;;  %v472_v33 = vadd.f32 %v471_v29, %v441_v27  ;;  %v448_v58 = vmul.f32 %v722_v50, %v722_v50 }
  0xd3   : > { %v473_v35 = vadd.f32 %v472_v33, %v442_v32  ;;  %v404_v38 = vadd.f32 %v403_v31, %v337_v12  ;;  %v364_v0 = vpop.f32.mrf.mxu2 }
  0xd4   : > { %v452_v7 = vmul.f32 %v364_v0, %v364_v0 }
  0xd5   : > { %v474_v44 = vadd.f32 %v473_v35, %v443_v40  ;;  %v405_v47 = vadd.f32 %v404_v38, %v340_v30 }
  0xd7   : > { %v406_v42 = vadd.f32 %v405_v47, %v712_v37  ;;  %v475_v51 = vadd.f32 %v474_v44, %v444_v36  ;;  %v385_v9 = vpop.f32.mrf.mxu3 }
  0xd8   : > { %v459_v28 = vmul.f32 %v385_v9, %v385_v9 }
  0xd9   : > { %v407_v52 = vadd.f32 %v406_v42, %v714_v41  ;;  %v476_v53 = vadd.f32 %v475_v51, %v445_v49  ;;  %v450_v41 = vmul.f32 %v358_v23, %v358_v23 }
  0xdb   : > { %v408_v55 = vadd.f32 %v407_v52, %v718_v45  ;;  %v477_v56 = vadd.f32 %v476_v53, %v446_v46 }
  0xdd   : > { %v478_v59 = vadd.f32 %v477_v56, %v447_v54  ;;  %v409_v37 = vadd.f32 %v408_v55, %v722_v50 }
  0xdf   : > { %v410_v61 = vadd.f32 %v409_v37, %v355_v5  ;;  %v479_v63 = vadd.f32 %v478_v59, %v448_v58  ;;  %v454_v5 = vmul.f32 %v720_v48, %v720_v48 }
  0xe1   : > { %v411_v1 = vadd.f32 %v410_v61, %v358_v23  ;;  %v480_v2 = vadd.f32 %v479_v63, %v449_v60  ;;  %v388_v23 = vpop.f32.mrf.mxu3 }
  0xe3   : > { %v481_v3 = vadd.f32 %v480_v2, %v450_v41  ;;  %v412_v4 = vadd.f32 %v411_v1, %v361_v39 }
  0xe5   : > { %v482_v45 = vadd.f32 %v481_v3, %v451_v6  ;;  %v413_v8 = vadd.f32 %v412_v4, %v364_v0 }
  0xe7   : > { %v414_v11 = vadd.f32 %v413_v8, %v716_v43  ;;  %v483_v50 = vadd.f32 %v482_v45, %v452_v7 }
  0xe9   : > { %v415_v12 = vadd.f32 %v414_v11, %v720_v48  ;;  %v484_v13 = vadd.f32 %v483_v50, %v453_v10 }
  0xeb   : > { %v416_v15 = vadd.f32 %v415_v12, %v724_v62  ;;  %v485_v17 = vadd.f32 %v484_v13, %v454_v5  ;;  %v460_v62 = vmul.f32 %v388_v23, %v388_v23 }
  0xed   : > { %v486_v19 = vadd.f32 %v485_v17, %v455_v14  ;;  %v417_v43 = vadd.f32 %v416_v15, %v726_v16 }
  0xef   : > { %v418_v21 = vadd.f32 %v417_v43, %v379_v34  ;;  %v487_v22 = vadd.f32 %v486_v19, %v456_v18 }
  0xf1   : > { %v419_v48 = vadd.f32 %v418_v21, %v382_v57  ;;  %v488_v25 = vadd.f32 %v487_v22, %v457_v20 }
  0xf3   : > { %v489_v26 = vadd.f32 %v488_v25, %v458_v24  ;;  %v420_v27 = vadd.f32 %v419_v48, %v385_v9 }
  0xf5   : > { %v490_v29 = vadd.f32 %v489_v26, %v459_v28  ;;  %v421_v30 = vadd.f32 %v420_v27, %v388_v23 }
  0xf7   : > { %v422_v31 = vrot.slane %v421_v30, 4  ;;  %v491_v32 = vadd.f32 %v490_v29, %v460_v62 }
  0xf9   : > { %v423_v33 = vadd.f32 %v422_v31, %v421_v30  ;;  %v492_v16 = vrot.slane %v491_v32, 4 }
  0xfb   : > { %v424_v35 = vrot.slane %v423_v33, 2  ;;  %v493_v38 = vadd.f32 %v492_v16, %v491_v32 }
  0xfd   : > { %v425_v34 = vadd.f32 %v424_v35, %v423_v33  ;;  %v494_v40 = vrot.slane %v493_v38, 2 }
  0xff   : > { %v426_v36 = vrot.slane %v425_v34, 1  ;;  %v495_v44 = vadd.f32 %v494_v40, %v493_v38 }
 0x101   : > { %v427_v47 = vadd.f32 %v426_v36, %v425_v34  ;;  %v496_v39 = vrot.slane %v495_v44, 1 }
 0x103   : > { %428 = vst [vmem:[%s143_s21] sm:$0x1] %v427_v47  ;;  %v497_v49 = vadd.f32 %v496_v39, %v495_v44 }
 0x105   : > { %498 = vst [vmem:[%s143_s21 + $0x1] sm:$0x1] %v497_v49 }
 0x106 PF: > { %s12_s9 = sadd.s32 1, %s612_s9  }
 0x107   : > { %p9_p5 = scmp.ge.s32.totalorder %s12_s9, 4  }
 0x109   :  { %11 = sbr.rel (!%p9_p5) target bundleno = 1 (0x1), region = 58 }

// kernel: upconv_forward.3
= control target key start
LH: loop header
LB: loop body
LE: loop exit
PB: predicated region body
PF: predicated region fallthrough
CT: control target
= control target key end

     0   :  { %s730_s15 = smov 0   ;;  %s931_s0 = inlined_call_operand.vmem [shape: f32[512,4], index: 0, kind: input, shape index: {}]   ;;  %s932_s1 = inlined_call_operand.vmem [shape: f32[4,128], index: 1, kind: input, shape index: {}]   ;;  %s933_s2 = inlined_call_operand.vmem [shape: f32[1,128], index: 2, kind: input, shape index: {}]   ;;  %s934_s3 = inlined_call_operand.vmem [shape: f32[1,128], index: 3, kind: input, shape index: {}]   ;;  %s935_s4 = inlined_call_operand.vmem [shape: f32[512,128], index: 4, kind: output, shape index: {}]  }
   0x1 LB: > { %s640_s16 = sadd.s32 4294967295, %s703_s15   ;;  %p644_p0 = scmp.ge.s32.totalorder %s703_s15, 1  ;;  %s703_s15 = sphi %s730_s15, %s14_s15  }
   0x2   : > { %p163_p1 = scmp.lt.s32.totalorder %s703_s15, 3 }
   0x4   : > { %p164_p2 = pnand %p644_p0, %p163_p1 }
   0x5   : > { %s645_s19 = sshll.u32 (!%p164_p2), %s640_s16, 5 }
   0x6   : > { %167 = sbr.rel (%p164_p2) target bundleno = 211 (0xd3), region = 36  ;;  %p190_p3 = scmp.lt.s32.totalorder (!%p164_p2), %s645_s19, 63 }
   0xb   : > { %v233_v0 = vld [vmem:[%s932_s1] sm:$0xf]  ;;  %vm331_vm0 = vcmask 1043456   ;;  %s937_s19 = smov (!%p190_p3, %s645_s19), 63  ;;  %vm234_vm1 = vcmask 31744  }
   0xc   : > { %685 = vmatpush.msk.msra.mxu2 %vm331_vm0, %v233_v0  ;;  %686 = vmatpush.msk.msra.mxu3 %vm331_vm0, %v233_v0  ;;  %s646_s20 = sshll.u32 %s937_s19, 3  ;;  %v818_v33 = vld [vmem:[%s933_s2] ss:$0 sm:$0xff] }
   0xd   : > { %649 = vmatpush.msk.msra.mxu0 %vm331_vm0, %v233_v0  ;;  %684 = vmatpush.msk.msra.mxu1 %vm331_vm0, %v233_v0  ;;  %s749_s23 = scalar_lea.vmem %s931_s0, %s646_s20  ;;  %v823_v34 = vld [vmem:[%s934_s3] ss:$0 sm:$0xff]  ;;  %s834_s30 = scalar_lea.vmem %s935_s4, %s646_s20 }
   0xe   : > { %v217_v1 = vld [vmem:[%s749_s23 + $0x80] sm:$0xff]  ;;  %v218_v5 = vld [vmem:[%s749_s23 + $0x88] sm:$0xff]  ;;  %v219_v9 = vld [vmem:[%s749_s23 + $0x90] sm:$0xff] }
   0xf   : > { %v225_v2 = vld [vmem:[%s749_s23 + $0xc0] sm:$0xff]  ;;  %666 = vmatmul.msk.f32.vlgmr.msra.gmra.mxu2 %vm234_vm1, %v217_v1  ;;  %v226_v6 = vld [vmem:[%s749_s23 + $0xc8] sm:$0xff]  ;;  %v227_v10 = vld [vmem:[%s749_s23 + $0xd0] sm:$0xff] }
  0x10   : > { %v201_v3 = vld [vmem:[%s749_s23] sm:$0xff]  ;;  %674 = vmatmul.msk.f32.vlgmr.msra.gmra.mxu3 %vm234_vm1, %v225_v2  ;;  %v202_v7 = vld [vmem:[%s749_s23 + $0x8] sm:$0xff]  ;;  %v203_v11 = vld [vmem:[%s749_s23 + $0x10] sm:$0xff] }
  0x11   : > { %v209_v4 = vld [vmem:[%s749_s23 + $0x40] sm:$0xff]  ;;  %650 = vmatmul.msk.f32.vlgmr.msra.gmra.mxu0 %vm234_vm1, %v201_v3  ;;  %v210_v8 = vld [vmem:[%s749_s23 + $0x48] sm:$0xff]  ;;  %v211_v12 = vld [vmem:[%s749_s23 + $0x50] sm:$0xff] }
  0x12   : > { %658 = vmatmul.msk.f32.vlgmr.msra.gmra.mxu1 %vm234_vm1, %v209_v4  ;;  %v220_v13 = vld [vmem:[%s749_s23 + $0x98] sm:$0xff]  ;;  %v221_v17 = vld [vmem:[%s749_s23 + $0xa0] sm:$0xff]  ;;  %v222_v21 = vld [vmem:[%s749_s23 + $0xa8] sm:$0xff] }
  0x13   : > { %v228_v14 = vld [vmem:[%s749_s23 + $0xd8] sm:$0xff]  ;;  %v229_v18 = vld [vmem:[%s749_s23 + $0xe0] sm:$0xff]  ;;  %v230_v22 = vld [vmem:[%s749_s23 + $0xe8] sm:$0xff] }
  0x14   : > { %v204_v15 = vld [vmem:[%s749_s23 + $0x18] sm:$0xff]  ;;  %v205_v19 = vld [vmem:[%s749_s23 + $0x20] sm:$0xff]  ;;  %v206_v23 = vld [vmem:[%s749_s23 + $0x28] sm:$0xff] }
  0x15   : > { %v212_v16 = vld [vmem:[%s749_s23 + $0x58] sm:$0xff]  ;;  %v213_v20 = vld [vmem:[%s749_s23 + $0x60] sm:$0xff]  ;;  %v214_v24 = vld [vmem:[%s749_s23 + $0x68] sm:$0xff] }
  0x16   : > { %v223_v25 = vld [vmem:[%s749_s23 + $0xb0] sm:$0xff]  ;;  %v224_v29 = vld [vmem:[%s749_s23 + $0xb8] sm:$0xff] }
  0x17   : > { %667 = vmatmul.msk.f32.gmra.mxu2 %vm234_vm1, %v218_v5  ;;  %v231_v26 = vld [vmem:[%s749_s23 + $0xf0] sm:$0xff]  ;;  %v232_v30 = vld [vmem:[%s749_s23 + $0xf8] sm:$0xff] }
  0x18   : > { %675 = vmatmul.msk.f32.gmra.mxu3 %vm234_vm1, %v226_v6  ;;  %v207_v27 = vld [vmem:[%s749_s23 + $0x30] sm:$0xff]  ;;  %v208_v31 = vld [vmem:[%s749_s23 + $0x38] sm:$0xff] }
  0x19   : > { %651 = vmatmul.msk.f32.gmra.mxu0 %vm234_vm1, %v202_v7  ;;  %v215_v28 = vld [vmem:[%s749_s23 + $0x70] sm:$0xff]  ;;  %v216_v32 = vld [vmem:[%s749_s23 + $0x78] sm:$0xff] }
  0x1a   : > { %659 = vmatmul.msk.f32.gmra.mxu1 %vm234_vm1, %v210_v8 }
  0x1f   : > { %668 = vmatmul.msk.f32.gmra.mxu2 %vm234_vm1, %v219_v9 }
  0x20   : > { %676 = vmatmul.msk.f32.gmra.mxu3 %vm234_vm1, %v227_v10 }
  0x21   : > { %652 = vmatmul.msk.f32.gmra.mxu0 %vm234_vm1, %v203_v11 }
  0x22   : > { %660 = vmatmul.msk.f32.gmra.mxu1 %vm234_vm1, %v211_v12 }
  0x27   : > { %669 = vmatmul.msk.f32.gmra.mxu2 %vm234_vm1, %v220_v13 }
  0x28   : > { %677 = vmatmul.msk.f32.gmra.mxu3 %vm234_vm1, %v228_v14 }
  0x29   : > { %653 = vmatmul.msk.f32.gmra.mxu0 %vm234_vm1, %v204_v15 }
  0x2a   : > { %661 = vmatmul.msk.f32.gmra.mxu1 %vm234_vm1, %v212_v16 }
  0x2f   : > { %670 = vmatmul.msk.f32.gmra.mxu2 %vm234_vm1, %v221_v17 }
  0x30   : > { %678 = vmatmul.msk.f32.gmra.mxu3 %vm234_vm1, %v229_v18 }
  0x31   : > { %654 = vmatmul.msk.f32.gmra.mxu0 %vm234_vm1, %v205_v19 }
  0x32   : > { %662 = vmatmul.msk.f32.gmra.mxu1 %vm234_vm1, %v213_v20 }
  0x37   : > { %671 = vmatmul.msk.f32.gmra.mxu2 %vm234_vm1, %v222_v21 }
  0x38   : > { %679 = vmatmul.msk.f32.gmra.mxu3 %vm234_vm1, %v230_v22 }
  0x39   : > { %655 = vmatmul.msk.f32.gmra.mxu0 %vm234_vm1, %v206_v23 }
  0x3a   : > { %663 = vmatmul.msk.f32.gmra.mxu1 %vm234_vm1, %v214_v24 }
  0x3f   : > { %672 = vmatmul.msk.f32.gmra.mxu2 %vm234_vm1, %v223_v25 }
  0x40   : > { %680 = vmatmul.msk.f32.gmra.mxu3 %vm234_vm1, %v231_v26 }
  0x41   : > { %656 = vmatmul.msk.f32.gmra.mxu0 %vm234_vm1, %v207_v27 }
  0x42   : > { %664 = vmatmul.msk.f32.gmra.mxu1 %vm234_vm1, %v215_v28 }
  0x47   : > { %673 = vmatmul.msk.f32.gmra.mxu2 %vm234_vm1, %v224_v29 }
  0x48   : > { %681 = vmatmul.msk.f32.gmra.mxu3 %vm234_vm1, %v232_v30 }
  0x49   : > { %657 = vmatmul.msk.f32.gmra.mxu0 %vm234_vm1, %v208_v31 }
  0x4a   : > { %665 = vmatmul.msk.f32.gmra.mxu1 %vm234_vm1, %v216_v32 }
  0x8e   : > { %v352_v35 = vpop.f32.mrf.mxu0 }
  0x8f   : > { %v376_v36 = vpop.f32.mrf.mxu1  ;;  %v452_v37 = vmul.f32 %v818_v33, %v352_v35 }
  0x90   : > { %v460_v38 = vmul.f32 %v818_v33, %v376_v36 }
  0x91   : > { %v488_v39 = vadd.f32 %v823_v34, %v452_v37 }
  0x92   : > { %v496_v40 = vadd.f32 %v823_v34, %v460_v38  ;;  %v400_v43 = vpop.f32.mrf.mxu2 }
  0x93   : > { %v520_v41 = vmax.f32 %v488_v39, 0.0  ;;  %v424_v44 = vpop.f32.mrf.mxu3  ;;  %v468_v45 = vmul.f32 %v818_v33, %v400_v43 }
  0x94   : > { %v528_v42 = vmax.f32 %v496_v40, 0.0  ;;  %v476_v46 = vmul.f32 %v818_v33, %v424_v44 }
  0x95   : > { %552 = vst [vmem:[%s834_s30] sm:$0xff] %v520_v41  ;;  %v504_v47 = vadd.f32 %v823_v34, %v468_v45 }
  0x96   : > { %560 = vst [vmem:[%s834_s30 + $0x40] sm:$0xff] %v528_v42  ;;  %v512_v48 = vadd.f32 %v823_v34, %v476_v46  ;;  %v355_v49 = vpop.f32.mrf.mxu0 }
  0x97   : > { %v379_v50 = vpop.f32.mrf.mxu1  ;;  %v453_v51 = vmul.f32 %v818_v33, %v355_v49  ;;  %v536_v53 = vmax.f32 %v504_v47, 0.0 }
  0x98   : > { %v461_v52 = vmul.f32 %v818_v33, %v379_v50  ;;  %v544_v54 = vmax.f32 %v512_v48, 0.0 }
  0x99   : > { %v489_v55 = vadd.f32 %v823_v34, %v453_v51  ;;  %568 = vst [vmem:[%s834_s30 + $0x80] sm:$0xff] %v536_v53 }
  0x9a   : > { %v497_v56 = vadd.f32 %v823_v34, %v461_v52  ;;  %576 = vst [vmem:[%s834_s30 + $0xc0] sm:$0xff] %v544_v54  ;;  %v403_v59 = vpop.f32.mrf.mxu2 }
  0x9b   : > { %v521_v57 = vmax.f32 %v489_v55, 0.0  ;;  %v427_v60 = vpop.f32.mrf.mxu3  ;;  %v469_v61 = vmul.f32 %v818_v33, %v403_v59 }
  0x9c   : > { %v529_v58 = vmax.f32 %v497_v56, 0.0  ;;  %v477_v62 = vmul.f32 %v818_v33, %v427_v60 }
  0x9d   : > { %553 = vst [vmem:[%s834_s30 + $0x8] sm:$0xff] %v521_v57  ;;  %v505_v63 = vadd.f32 %v823_v34, %v469_v61 }
  0x9e   : > { %561 = vst [vmem:[%s834_s30 + $0x48] sm:$0xff] %v529_v58  ;;  %v513_v0 = vadd.f32 %v823_v34, %v477_v62  ;;  %v358_v1 = vpop.f32.mrf.mxu0 }
  0x9f   : > { %v382_v2 = vpop.f32.mrf.mxu1  ;;  %v454_v3 = vmul.f32 %v818_v33, %v358_v1  ;;  %v537_v5 = vmax.f32 %v505_v63, 0.0 }
  0xa0   : > { %v462_v4 = vmul.f32 %v818_v33, %v382_v2  ;;  %v545_v6 = vmax.f32 %v513_v0, 0.0 }
  0xa1   : > { %v490_v7 = vadd.f32 %v823_v34, %v454_v3  ;;  %569 = vst [vmem:[%s834_s30 + $0x88] sm:$0xff] %v537_v5 }
  0xa2   : > { %v498_v8 = vadd.f32 %v823_v34, %v462_v4  ;;  %577 = vst [vmem:[%s834_s30 + $0xc8] sm:$0xff] %v545_v6  ;;  %v406_v11 = vpop.f32.mrf.mxu2 }
  0xa3   : > { %v522_v9 = vmax.f32 %v490_v7, 0.0  ;;  %v430_v12 = vpop.f32.mrf.mxu3  ;;  %v470_v13 = vmul.f32 %v818_v33, %v406_v11 }
  0xa4   : > { %v530_v10 = vmax.f32 %v498_v8, 0.0  ;;  %v478_v14 = vmul.f32 %v818_v33, %v430_v12 }
  0xa5   : > { %554 = vst [vmem:[%s834_s30 + $0x10] sm:$0xff] %v522_v9  ;;  %v506_v15 = vadd.f32 %v823_v34, %v470_v13 }
  0xa6   : > { %562 = vst [vmem:[%s834_s30 + $0x50] sm:$0xff] %v530_v10  ;;  %v514_v16 = vadd.f32 %v823_v34, %v478_v14  ;;  %v361_v17 = vpop.f32.mrf.mxu0 }
  0xa7   : > { %v385_v18 = vpop.f32.mrf.mxu1  ;;  %v455_v19 = vmul.f32 %v818_v33, %v361_v17  ;;  %v538_v21 = vmax.f32 %v506_v15, 0.0 }
  0xa8   : > { %v463_v20 = vmul.f32 %v818_v33, %v385_v18  ;;  %v546_v22 = vmax.f32 %v514_v16, 0.0 }
  0xa9   : > { %v491_v23 = vadd.f32 %v823_v34, %v455_v19  ;;  %570 = vst [vmem:[%s834_s30 + $0x90] sm:$0xff] %v538_v21 }
  0xaa   : > { %v499_v24 = vadd.f32 %v823_v34, %v463_v20  ;;  %578 = vst [vmem:[%s834_s30 + $0xd0] sm:$0xff] %v546_v22  ;;  %v409_v27 = vpop.f32.mrf.mxu2 }
  0xab   : > { %v523_v25 = vmax.f32 %v491_v23, 0.0  ;;  %v433_v28 = vpop.f32.mrf.mxu3  ;;  %v471_v29 = vmul.f32 %v818_v33, %v409_v27 }
  0xac   : > { %v531_v26 = vmax.f32 %v499_v24, 0.0  ;;  %v479_v30 = vmul.f32 %v818_v33, %v433_v28 }
  0xad   : > { %555 = vst [vmem:[%s834_s30 + $0x18] sm:$0xff] %v523_v25  ;;  %v507_v31 = vadd.f32 %v823_v34, %v471_v29 }
  0xae   : > { %563 = vst [vmem:[%s834_s30 + $0x58] sm:$0xff] %v531_v26  ;;  %v515_v32 = vadd.f32 %v823_v34, %v479_v30  ;;  %v364_v35 = vpop.f32.mrf.mxu0 }
  0xaf   : > { %v388_v36 = vpop.f32.mrf.mxu1  ;;  %v456_v37 = vmul.f32 %v818_v33, %v364_v35  ;;  %v539_v39 = vmax.f32 %v507_v31, 0.0 }
  0xb0   : > { %v464_v38 = vmul.f32 %v818_v33, %v388_v36  ;;  %v547_v40 = vmax.f32 %v515_v32, 0.0 }
  0xb1   : > { %v492_v41 = vadd.f32 %v823_v34, %v456_v37  ;;  %571 = vst [vmem:[%s834_s30 + $0x98] sm:$0xff] %v539_v39 }
  0xb2   : > { %v500_v42 = vadd.f32 %v823_v34, %v464_v38  ;;  %579 = vst [vmem:[%s834_s30 + $0xd8] sm:$0xff] %v547_v40  ;;  %v412_v45 = vpop.f32.mrf.mxu2 }
  0xb3   : > { %v524_v43 = vmax.f32 %v492_v41, 0.0  ;;  %v436_v46 = vpop.f32.mrf.mxu3  ;;  %v472_v47 = vmul.f32 %v818_v33, %v412_v45 }
  0xb4   : > { %v532_v44 = vmax.f32 %v500_v42, 0.0  ;;  %v480_v48 = vmul.f32 %v818_v33, %v436_v46 }
  0xb5   : > { %556 = vst [vmem:[%s834_s30 + $0x20] sm:$0xff] %v524_v43  ;;  %v508_v49 = vadd.f32 %v823_v34, %v472_v47 }
  0xb6   : > { %564 = vst [vmem:[%s834_s30 + $0x60] sm:$0xff] %v532_v44  ;;  %v516_v50 = vadd.f32 %v823_v34, %v480_v48  ;;  %v367_v51 = vpop.f32.mrf.mxu0 }
  0xb7   : > { %v391_v52 = vpop.f32.mrf.mxu1  ;;  %v457_v53 = vmul.f32 %v818_v33, %v367_v51  ;;  %v540_v55 = vmax.f32 %v508_v49, 0.0 }
  0xb8   : > { %v465_v54 = vmul.f32 %v818_v33, %v391_v52  ;;  %v548_v56 = vmax.f32 %v516_v50, 0.0 }
  0xb9   : > { %v493_v57 = vadd.f32 %v823_v34, %v457_v53  ;;  %572 = vst [vmem:[%s834_s30 + $0xa0] sm:$0xff] %v540_v55 }
  0xba   : > { %v501_v58 = vadd.f32 %v823_v34, %v465_v54  ;;  %580 = vst [vmem:[%s834_s30 + $0xe0] sm:$0xff] %v548_v56  ;;  %v415_v61 = vpop.f32.mrf.mxu2 }
  0xbb   : > { %v525_v59 = vmax.f32 %v493_v57, 0.0  ;;  %v439_v62 = vpop.f32.mrf.mxu3  ;;  %v473_v63 = vmul.f32 %v818_v33, %v415_v61 }
  0xbc   : > { %v533_v60 = vmax.f32 %v501_v58, 0.0  ;;  %v481_v0 = vmul.f32 %v818_v33, %v439_v62 }
  0xbd   : > { %557 = vst [vmem:[%s834_s30 + $0x28] sm:$0xff] %v525_v59  ;;  %v509_v1 = vadd.f32 %v823_v34, %v473_v63 }
  0xbe   : > { %565 = vst [vmem:[%s834_s30 + $0x68] sm:$0xff] %v533_v60  ;;  %v517_v2 = vadd.f32 %v823_v34, %v481_v0  ;;  %v370_v3 = vpop.f32.mrf.mxu0 }
  0xbf   : > { %v394_v4 = vpop.f32.mrf.mxu1  ;;  %v458_v5 = vmul.f32 %v818_v33, %v370_v3  ;;  %v541_v7 = vmax.f32 %v509_v1, 0.0 }
  0xc0   : > { %v466_v6 = vmul.f32 %v818_v33, %v394_v4  ;;  %v549_v8 = vmax.f32 %v517_v2, 0.0 }
  0xc1   : > { %v494_v9 = vadd.f32 %v823_v34, %v458_v5  ;;  %573 = vst [vmem:[%s834_s30 + $0xa8] sm:$0xff] %v541_v7 }
  0xc2   : > { %v502_v10 = vadd.f32 %v823_v34, %v466_v6  ;;  %581 = vst [vmem:[%s834_s30 + $0xe8] sm:$0xff] %v549_v8  ;;  %v418_v13 = vpop.f32.mrf.mxu2 }
  0xc3   : > { %v526_v11 = vmax.f32 %v494_v9, 0.0  ;;  %v442_v14 = vpop.f32.mrf.mxu3  ;;  %v474_v15 = vmul.f32 %v818_v33, %v418_v13 }
  0xc4   : > { %v534_v12 = vmax.f32 %v502_v10, 0.0  ;;  %v482_v16 = vmul.f32 %v818_v33, %v442_v14 }
  0xc5   : > { %558 = vst [vmem:[%s834_s30 + $0x30] sm:$0xff] %v526_v11  ;;  %v510_v17 = vadd.f32 %v823_v34, %v474_v15 }
  0xc6   : > { %566 = vst [vmem:[%s834_s30 + $0x70] sm:$0xff] %v534_v12  ;;  %v518_v18 = vadd.f32 %v823_v34, %v482_v16  ;;  %v373_v19 = vpop.f32.mrf.mxu0 }
  0xc7   : > { %v397_v20 = vpop.f32.mrf.mxu1  ;;  %v459_v21 = vmul.f32 %v818_v33, %v373_v19  ;;  %v542_v23 = vmax.f32 %v510_v17, 0.0 }
  0xc8   : > { %v467_v22 = vmul.f32 %v818_v33, %v397_v20  ;;  %v550_v24 = vmax.f32 %v518_v18, 0.0 }
  0xc9   : > { %v495_v25 = vadd.f32 %v823_v34, %v459_v21  ;;  %574 = vst [vmem:[%s834_s30 + $0xb0] sm:$0xff] %v542_v23 }
  0xca   : > { %v503_v26 = vadd.f32 %v823_v34, %v467_v22  ;;  %582 = vst [vmem:[%s834_s30 + $0xf0] sm:$0xff] %v550_v24  ;;  %v421_v29 = vpop.f32.mrf.mxu2 }
  0xcb   : > { %v527_v27 = vmax.f32 %v495_v25, 0.0  ;;  %v445_v30 = vpop.f32.mrf.mxu3  ;;  %v475_v31 = vmul.f32 %v818_v33, %v421_v29 }
  0xcc   : > { %v535_v28 = vmax.f32 %v503_v26, 0.0  ;;  %v483_v32 = vmul.f32 %v818_v33, %v445_v30 }
  0xcd   : > { %559 = vst [vmem:[%s834_s30 + $0x38] sm:$0xff] %v527_v27  ;;  %v511_v35 = vadd.f32 %v823_v34, %v475_v31 }
  0xce   : > { %567 = vst [vmem:[%s834_s30 + $0x78] sm:$0xff] %v535_v28  ;;  %v519_v36 = vadd.f32 %v823_v34, %v483_v32 }
  0xcf   : > { %v543_v37 = vmax.f32 %v511_v35, 0.0 }
  0xd0   : > { %v551_v38 = vmax.f32 %v519_v36, 0.0 }
  0xd1   : > { %575 = vst [vmem:[%s834_s30 + $0xb8] sm:$0xff] %v543_v37 }
  0xd2   : > { %583 = vst [vmem:[%s834_s30 + $0xf8] sm:$0xff] %v551_v38 }
  0xd3 PF: > { %s14_s15 = sadd.s32 1, %s703_s15  }
  0xd4   : > { %p11_p4 = scmp.ge.s32.totalorder %s14_s15, 4  }
  0xd6   :  { %13 = sbr.rel (!%p11_p4) target bundleno = 1 (0x1), region = 66 }

</bundles_post_ra>
